<compile_context>
chip_gen: v5e
topology: v5e:2x2
jax: 0.10.0
libtpu: 0.0.40
codegen_flags: <defaults>
</compile_context>

<pallas_src>
import functools

import jax
import jax.numpy as jnp
from jax.experimental import pallas as pl
from jax.experimental.pallas import tpu as pltpu

_LANE = 128
_SUBLANE_BF16 = 16


def _round_up(n: int, m: int) -> int:
    return ((n + m - 1) // m) * m


def enet_kernel(x_ref, w1_ref, b1_ref, w2_ref, b2_ref, w3_ref, b3_ref, o_ref):
    """Fused 3-layer MLP: bf16 MXU matmuls, f32 accumulation, f32 sigmoids."""
    x = x_ref[...].astype(jnp.bfloat16)                               # [tb, K]
    h1 = jnp.dot(x, w1_ref[...], preferred_element_type=jnp.float32) + b1_ref[...]
    h1 = jax.nn.sigmoid(h1)                                           # f32 [tb, H1]
    h2 = (
        jnp.dot(h1.astype(jnp.bfloat16), w2_ref[...],
                preferred_element_type=jnp.float32)
        + b2_ref[...]
    )
    h2 = jax.nn.sigmoid(h2)                                           # f32 [tb, H2p]
    o_ref[...] = (
        jnp.dot(h2.astype(jnp.bfloat16), w3_ref[...],
                preferred_element_type=jnp.float32)
        + b3_ref[...]
    )                                                                 # f32 [tb, C]


@functools.partial(jax.jit, static_argnames=("tile_b",))
def _enet_forward(x, w1, b1, w2, b2, w3, b3, *, tile_b):
    B, K = x.shape
    H1 = w1.shape[1]
    H2 = w2.shape[1]
    C = w3.shape[1]
    H2p = _round_up(H2, _LANE)

    bf16, f32 = jnp.bfloat16, jnp.float32

    # Weights/biases are tiny (<100 KB total): casting/padding them here is
    # negligible, and constant block indices keep them VMEM resident.
    w1b = w1.astype(bf16)                                             # (K, H1)
    b1f = b1.astype(f32).reshape(1, H1)
    w2b = jnp.pad(w2.astype(bf16), ((0, 0), (0, H2p - H2)))           # (H1, H2p)
    b2f = jnp.pad(b2.astype(f32).reshape(1, H2), ((0, 0), (0, H2p - H2)))
    # Zero *rows* of W3 for the padded H2 lanes: sigmoid(0)=0.5 on those lanes
    # is annihilated by the zero weights, so padding cannot leak downstream.
    w3b = jnp.pad(w3.astype(bf16), ((0, H2p - H2), (0, 0)))           # (H2p, C)
    b3f = b3.astype(f32).reshape(1, C)

    grid = (pl.cdiv(B, tile_b),)
    rep = lambda i: (0, 0)   # constant block index -> DMA'd once, VMEM resident

    cost = pl.CostEstimate(
        flops=2 * B * (K * H1 + H1 * H2p + H2p * C),
        transcendentals=B * (H1 + H2p),
        bytes_accessed=(
            B * K * x.dtype.itemsize                 # x read
            + (w1b.size + w2b.size + w3b.size) * 2   # bf16 weights (read once)
            + (b1f.size + b2f.size + b3f.size) * 4   # f32 biases
            + B * C * 4                              # narrow f32 output
        ),
    )

    return pl.pallas_call(
        enet_kernel,
        out_shape=jax.ShapeDtypeStruct((B, C), jnp.float32),
        grid_spec=pl.GridSpec(
            grid=grid,
            in_specs=[
                pl.BlockSpec((tile_b, K), lambda i: (i, 0)),   # x streamed raw
                pl.BlockSpec((K, H1), rep),                    # W1
                pl.BlockSpec((1, H1), rep),                    # b1
                pl.BlockSpec((H1, H2p), rep),                  # W2 (lane-padded)
                pl.BlockSpec((1, H2p), rep),                   # b2
                pl.BlockSpec((H2p, C), rep),                   # W3 (narrow N)
                pl.BlockSpec((1, C), rep),                     # b3
            ],
            out_specs=pl.BlockSpec((tile_b, C), lambda i: (i, 0)),  # narrow out
        ),
        compiler_params=pltpu.CompilerParams(
            dimension_semantics=("parallel",),   # batch axis -> both TCs on v7x
        ),
        cost_estimate=cost,
    )(x, w1b, b1f, w2b, b2f, w3b, b3f)


def _pick_tile_b(B: int, max_tile_b: int = 2048) -> int:
    """Largest sensible batch tile (multiple of 16 = bf16 sublane tile)."""
    Bp = _round_up(max(B, 1), _SUBLANE_BF16)
    if Bp <= 1024:
        return Bp                      # one step; overhead is negligible here
    # Keep >= 2 grid steps so both v7x TensorCores get work; cap the tile so
    # VMEM stays trivial (x 2048*K*4B + out 2048*C*4B, double-buffered).
    half = _round_up((Bp + 1) // 2, _SUBLANE_BF16)
    return min(max_tile_b, half)


def enet_forward(x, w1, b1, w2, b2, w3, b3, *, max_tile_b=2048):
    """ENET forward pass. x: [B, num_att] f32 -> [B, num_class] f32."""
    tile_b = _pick_tile_b(int(x.shape[0]), max_tile_b)
    return _enet_forward(x, w1, b1, w2, b2, w3, b3, tile_b=tile_b)


def init_linear(key, fan_in, fan_out):
    """PyTorch-like init U(-1/sqrt(fan_in), 1/sqrt(fan_in)).

    W returned as [fan_in, fan_out] (transposed for x @ W), b as [1, fan_out].
    """
    kw, kb = jax.random.split(key)
    bound = 1.0 / jnp.sqrt(jnp.float32(fan_in))
    w = jax.random.uniform(kw, (fan_in, fan_out), jnp.float32, -bound, bound)
    b = jax.random.uniform(kb, (1, fan_out), jnp.float32, -bound, bound)
    return w, b


def enet_reference(x, w1, b1, w2, b2, w3, b3, *, matmul_dtype=jnp.float32):
    dt = matmul_dtype
    h1 = jax.nn.sigmoid(
        jnp.dot(x.astype(dt), w1.astype(dt), preferred_element_type=jnp.float32) + b1)
    h2 = jax.nn.sigmoid(
        jnp.dot(h1.astype(dt), w2.astype(dt), preferred_element_type=jnp.float32) + b2)
    return jnp.dot(h2.astype(dt), w3.astype(dt),
                   preferred_element_type=jnp.float32) + b3


if __name__ == "__main__":
    # Small shapes consistent with ENET(num_att=32, num_class=10, mapping_len=100).
    B = 16
    num_att = 32
    H1 = 128          # fixed in ENET.__init__
    H2 = 100          # mapping_len default (deliberately NOT a multiple of 128)
    num_class = 10

    key = jax.random.PRNGKey(0)
    kx, k1, k2, k3 = jax.random.split(key, 4)

    x = jax.random.normal(kx, (B, num_att), jnp.float32)
    w1, b1 = init_linear(k1, num_att, H1)
    w2, b2 = init_linear(k2, H1, H2)
    w3, b3 = init_linear(k3, H2, num_class)

    out = enet_forward(x, w1, b1, w2, b2, w3, b3)
    out = jax.block_until_ready(out)
    assert out.shape == (B, num_class)

    # Tight check vs a reference that uses the same bf16 matmul operands
    # (also exercises the H2=100 weight padding: padded lanes must not leak).
    ref_bf16 = enet_reference(x, w1, b1, w2, b2, w3, b3, matmul_dtype=jnp.bfloat16)
    assert jnp.allclose(out, ref_bf16, atol=1e-2, rtol=1e-2), "mismatch vs bf16 reference"

    # Loose sanity check vs the full-f32 PyTorch-equivalent math.
    ref_f32 = enet_reference(x, w1, b1, w2, b2, w3, b3, matmul_dtype=jnp.float32)
    assert jnp.allclose(out, ref_f32, atol=5e-2, rtol=5e-2), "mismatch vs f32 reference"

    # Ragged-batch test: B not a multiple of 16 -> partial last block, masked
    # output stores must drop the garbage tail rows.
    Br = 19
    xr = jax.random.normal(jax.random.PRNGKey(1), (Br, num_att), jnp.float32)
    out_r = jax.block_until_ready(enet_forward(xr, w1, b1, w2, b2, w3, b3))
    ref_r = enet_reference(xr, w1, b1, w2, b2, w3, b3, matmul_dtype=jnp.bfloat16)
    assert out_r.shape == (Br, num_class)
    assert jnp.allclose(out_r, ref_r, atol=1e-2, rtol=1e-2), "mismatch on ragged batch"

    print("KERNEL_OK")
</pallas_src>

<mosaic_0001>
module attributes {stable_mosaic.version = 11 : i64} {
  func.func @enet_kernel(%arg0: i32, %arg1: memref<16x32xf32, #tpu.memory_space<vmem>>, %arg2: memref<32x128xbf16, #tpu.memory_space<vmem>>, %arg3: memref<1x128xf32, #tpu.memory_space<vmem>>, %arg4: memref<128x128xbf16, #tpu.memory_space<vmem>>, %arg5: memref<1x128xf32, #tpu.memory_space<vmem>>, %arg6: memref<128x10xbf16, #tpu.memory_space<vmem>>, %arg7: memref<1x10xf32, #tpu.memory_space<vmem>>, %arg8: memref<16x10xf32, #tpu.memory_space<vmem>>) attributes {dimension_semantics = [#tpu.dimension_semantics<parallel>], iteration_bounds = array<i64: 1>, scalar_prefetch = 0 : i64, scratch_operands = 0 : i64, tpu.core_type = #tpu.core_type<tc>, window_params = [{transform_indices = @transform_0, window_bounds = array<i64: 16, 32>}, {pipeline_mode = #tpu.pipeline_mode<synchronous>, transform_indices = @transform_1, window_bounds = array<i64: 32, 128>}, {pipeline_mode = #tpu.pipeline_mode<synchronous>, transform_indices = @transform_2, window_bounds = array<i64: 1, 128>}, {pipeline_mode = #tpu.pipeline_mode<synchronous>, transform_indices = @transform_3, window_bounds = array<i64: 128, 128>}, {pipeline_mode = #tpu.pipeline_mode<synchronous>, transform_indices = @transform_4, window_bounds = array<i64: 1, 128>}, {pipeline_mode = #tpu.pipeline_mode<synchronous>, transform_indices = @transform_5, window_bounds = array<i64: 128, 10>}, {pipeline_mode = #tpu.pipeline_mode<synchronous>, transform_indices = @transform_6, window_bounds = array<i64: 1, 10>}, {transform_indices = @transform_7, window_bounds = array<i64: 16, 10>}]} {
    %c0 = arith.constant 0 : index
    %c0_0 = arith.constant 0 : index
    %0 = vector.load %arg1[%c0, %c0_0] : memref<16x32xf32, #tpu.memory_space<vmem>>, vector<16x32xf32>
    %1 = arith.truncf %0 : vector<16x32xf32> to vector<16x32xbf16>
    %c0_1 = arith.constant 0 : index
    %c0_2 = arith.constant 0 : index
    %2 = vector.load %arg2[%c0_1, %c0_2] : memref<32x128xbf16, #tpu.memory_space<vmem>>, vector<32x128xbf16>
    %cst = arith.constant dense<0.000000e+00> : vector<16x128xf32>
    %3 = tpu.matmul %1, %2, %cst {dimension_numbers = #tpu.dot_dimension_numbers<[1], [0], [0], [1], [0, 0, 1, 1], [], []>} : vector<16x32xbf16>, vector<32x128xbf16>, vector<16x128xf32> -> vector<16x128xf32>
    %c0_3 = arith.constant 0 : index
    %c0_4 = arith.constant 0 : index
    %4 = vector.load %arg3[%c0_3, %c0_4] : memref<1x128xf32, #tpu.memory_space<vmem>>, vector<1x128xf32>
    %5 = vector.broadcast %4 : vector<1x128xf32> to vector<16x128xf32>
    %6 = arith.addf %3, %5 : vector<16x128xf32>
    %7 = arith.negf %6 : vector<16x128xf32>
    %8 = math.exp %7 : vector<16x128xf32>
    %cst_5 = arith.constant 1.000000e+00 : f32
    %9 = vector.broadcast %cst_5 : f32 to vector<16x128xf32>
    %10 = arith.addf %9, %8 : vector<16x128xf32>
    %11 = arith.divf %9, %10 : vector<16x128xf32>
    %12 = arith.truncf %11 : vector<16x128xf32> to vector<16x128xbf16>
    %c0_6 = arith.constant 0 : index
    %c0_7 = arith.constant 0 : index
    %13 = vector.load %arg4[%c0_6, %c0_7] : memref<128x128xbf16, #tpu.memory_space<vmem>>, vector<128x128xbf16>
    %cst_8 = arith.constant dense<0.000000e+00> : vector<16x128xf32>
    %14 = tpu.matmul %12, %13, %cst_8 {dimension_numbers = #tpu.dot_dimension_numbers<[1], [0], [0], [1], [0, 0, 1, 1], [], []>} : vector<16x128xbf16>, vector<128x128xbf16>, vector<16x128xf32> -> vector<16x128xf32>
    %c0_9 = arith.constant 0 : index
    %c0_10 = arith.constant 0 : index
    %15 = vector.load %arg5[%c0_9, %c0_10] : memref<1x128xf32, #tpu.memory_space<vmem>>, vector<1x128xf32>
    %16 = vector.broadcast %15 : vector<1x128xf32> to vector<16x128xf32>
    %17 = arith.addf %14, %16 : vector<16x128xf32>
    %18 = arith.negf %17 : vector<16x128xf32>
    %19 = math.exp %18 : vector<16x128xf32>
    %cst_11 = arith.constant 1.000000e+00 : f32
    %20 = vector.broadcast %cst_11 : f32 to vector<16x128xf32>
    %21 = arith.addf %20, %19 : vector<16x128xf32>
    %22 = arith.divf %20, %21 : vector<16x128xf32>
    %23 = arith.truncf %22 : vector<16x128xf32> to vector<16x128xbf16>
    %c0_12 = arith.constant 0 : index
    %c0_13 = arith.constant 0 : index
    %24 = vector.load %arg6[%c0_12, %c0_13] : memref<128x10xbf16, #tpu.memory_space<vmem>>, vector<128x10xbf16>
    %cst_14 = arith.constant dense<0.000000e+00> : vector<16x10xf32>
    %25 = tpu.matmul %23, %24, %cst_14 {dimension_numbers = #tpu.dot_dimension_numbers<[1], [0], [0], [1], [0, 0, 1, 1], [], []>} : vector<16x128xbf16>, vector<128x10xbf16>, vector<16x10xf32> -> vector<16x10xf32>
    %c0_15 = arith.constant 0 : index
    %c0_16 = arith.constant 0 : index
    %26 = vector.load %arg7[%c0_15, %c0_16] : memref<1x10xf32, #tpu.memory_space<vmem>>, vector<1x10xf32>
    %27 = vector.broadcast %26 : vector<1x10xf32> to vector<16x10xf32>
    %28 = arith.addf %25, %27 : vector<16x10xf32>
    %c0_17 = arith.constant 0 : index
    %c0_18 = arith.constant 0 : index
    %29 = vector.load %arg8[%c0_17, %c0_18] : memref<16x10xf32, #tpu.memory_space<vmem>>, vector<16x10xf32>
    tpu.vector_store %arg8[%c0_17, %c0_18], %28 {strides = array<i32>} : memref<16x10xf32, #tpu.memory_space<vmem>>, vector<16x10xf32>,
    return
  }
  func.func @transform_0(%arg0: i32) -> (i32, i32) {
    %c0_i32 = arith.constant 0 : i32
    %c0_i32_0 = arith.constant 0 : i32
    return %arg0, %c0_i32 : i32, i32
  }
  func.func @transform_1(%arg0: i32) -> (i32, i32) {
    %c0_i32 = arith.constant 0 : i32
    %c0_i32_0 = arith.constant 0 : i32
    %c0_i32_1 = arith.constant 0 : i32
    return %c0_i32, %c0_i32_0 : i32, i32
  }
  func.func @transform_2(%arg0: i32) -> (i32, i32) {
    %c0_i32 = arith.constant 0 : i32
    %c0_i32_0 = arith.constant 0 : i32
    %c0_i32_1 = arith.constant 0 : i32
    return %c0_i32, %c0_i32_0 : i32, i32
  }
  func.func @transform_3(%arg0: i32) -> (i32, i32) {
    %c0_i32 = arith.constant 0 : i32
    %c0_i32_0 = arith.constant 0 : i32
    %c0_i32_1 = arith.constant 0 : i32
    return %c0_i32, %c0_i32_0 : i32, i32
  }
  func.func @transform_4(%arg0: i32) -> (i32, i32) {
    %c0_i32 = arith.constant 0 : i32
    %c0_i32_0 = arith.constant 0 : i32
    %c0_i32_1 = arith.constant 0 : i32
    return %c0_i32, %c0_i32_0 : i32, i32
  }
  func.func @transform_5(%arg0: i32) -> (i32, i32) {
    %c0_i32 = arith.constant 0 : i32
    %c0_i32_0 = arith.constant 0 : i32
    %c0_i32_1 = arith.constant 0 : i32
    return %c0_i32, %c0_i32_0 : i32, i32
  }
  func.func @transform_6(%arg0: i32) -> (i32, i32) {
    %c0_i32 = arith.constant 0 : i32
    %c0_i32_0 = arith.constant 0 : i32
    %c0_i32_1 = arith.constant 0 : i32
    return %c0_i32, %c0_i32_0 : i32, i32
  }
  func.func @transform_7(%arg0: i32) -> (i32, i32) {
    %c0_i32 = arith.constant 0 : i32
    %c0_i32_0 = arith.constant 0 : i32
    return %arg0, %c0_i32 : i32, i32
  }
}

</mosaic_0001>

<bundles_post_ra>
// kernel: _enet_forward.1
= control target key start
LH: loop header
LB: loop body
LE: loop exit
PB: predicated region body
PF: predicated region fallthrough
CT: control target
= control target key end

     0   :  { %s590_s0 = inlined_call_operand.vmem [shape: f32[16,32], index: 0, kind: input, shape index: {}]   ;;  %s591_s1 = inlined_call_operand.vmem [shape: bf16[32,128], index: 1, kind: input, shape index: {}]   ;;  %s592_s2 = inlined_call_operand.vmem [shape: f32[1,128], index: 2, kind: input, shape index: {}]   ;;  %s593_s3 = inlined_call_operand.vmem [shape: bf16[128,128], index: 3, kind: input, shape index: {}]   ;;  %s594_s4 = inlined_call_operand.vmem [shape: f32[1,128], index: 4, kind: input, shape index: {}]   ;;  %s595_s5 = inlined_call_operand.vmem [shape: bf16[128,10], index: 5, kind: input, shape index: {}]   ;;  %s596_s6 = inlined_call_operand.vmem [shape: f32[1,10], index: 6, kind: input, shape index: {}]   ;;  %s597_s7 = inlined_call_operand.hbm [shape: f32[16,10], index: 7, kind: output, shape index: {}]  }
   0x1   :  { %v410_v0 = vld [vmem:[%s591_s1 + $0x8] sm:$0xff]  ;;  %v409_v1 = vld [vmem:[%s591_s1] sm:$0xff] }
   0x2   :  { %v28_v2 = vld [vmem:[%s590_s0] sm:$0xff]  ;;  %v29_v3 = vld [vmem:[%s590_s0 + $0x8] sm:$0xff]  ;;  %61 = vmatpush.bf16.msra.mxu0 %v410_v0 }
   0x3   :  { %12 = vsyncpa [#allocation3], 0  ;;  %v30_v4 = vpack.c.bf16 %v29_v3, %v28_v2  ;;  %vm51_vm0 = vcmask 261120   ;;  %v418_v5 = vld [vmem:[%s593_s3 + $0x38] sm:$0xff]  ;;  %v417_v6 = vld [vmem:[%s593_s3 + $0x30] sm:$0xff]  ;;  %s475_s16 = smov [#allocation2]  }
   0x4   :  { %176 = vmatpush.bf16.msra.mxu1 %v418_v5  ;;  %v416_v7 = vld [vmem:[%s593_s3 + $0x28] sm:$0xff]  ;;  %v415_v8 = vld [vmem:[%s593_s3 + $0x20] sm:$0xff]  ;;  %v414_v9 = vld [vmem:[%s593_s3 + $0x18] sm:$0xff]  ;;  %s318_s17 = sshll.u32 %s475_s16, 4  ;;  %s320_s20 = sshll.u32 %s597_s7, 4  ;;  %s319_s17 = int_to_ptr.vmem [resolvable:$true] %s318_s17  ;;  %s321_s20 = int_to_ptr.hbm [resolvable:$true] %s320_s20 }
   0x5   :  { %v413_v10 = vld [vmem:[%s593_s3 + $0x10] sm:$0xff]  ;;  %v430_v11 = vld [vmem:[%s592_s2] ss:$0 sm:$0xff]  ;;  %v412_v12 = vld [vmem:[%s593_s3 + $0x8] sm:$0xff]  ;;  %s476_s21 = smov 128   ;;  %s477_s22 = smov 8  }
   0x6   :  { %62 = vmatpush.bf16.msra.mxu0 %v409_v1  ;;  %v411_v15 = vld [vmem:[%s593_s3] sm:$0xff]  ;;  %v426_v45 = vld [vmem:[%s595_s5 + $0x38] sm:$0xff]  ;;  %v425_v46 = vld [vmem:[%s595_s5 + $0x30] sm:$0xff] }
   0x7   :  { %297 = vmatpush.bf16.msra.mxu2 %v426_v45  ;;  %v424_v47 = vld [vmem:[%s595_s5 + $0x28] sm:$0xff]  ;;  %v423_v48 = vld [vmem:[%s595_s5 + $0x20] sm:$0xff]  ;;  %v422_v49 = vld [vmem:[%s595_s5 + $0x18] sm:$0xff] }
   0x8   :  { %177 = vmatpush.bf16.msra.mxu1 %v417_v6  ;;  %v421_v50 = vld [vmem:[%s595_s5 + $0x10] sm:$0xff]  ;;  %v431_v51 = vld [vmem:[%s594_s4] ss:$0 sm:$0xff]  ;;  %v420_v52 = vld [vmem:[%s595_s5 + $0x8] sm:$0xff] }
   0x9   :  { %340 = vmatmul.msk.bf16.vlgmr.msra.gmra.mxu0 %vm51_vm0, %v30_v4  ;;  %v419_v55 = vld [vmem:[%s595_s5] sm:$0xff] }
   0xb   :  { %298 = vmatpush.bf16.msra.mxu2 %v425_v46 }
   0xc   :  { %178 = vmatpush.bf16.msra.mxu1 %v416_v7 }
   0xf   :  { %299 = vmatpush.bf16.msra.mxu2 %v424_v47 }
  0x10   :  { %179 = vmatpush.bf16.msra.mxu1 %v415_v8 }
  0x13   :  { %300 = vmatpush.bf16.msra.mxu2 %v423_v48 }
  0x14   :  { %180 = vmatpush.bf16.msra.mxu1 %v414_v9 }
  0x17   :  { %301 = vmatpush.bf16.msra.mxu2 %v422_v49 }
  0x18   :  { %181 = vmatpush.bf16.msra.mxu1 %v413_v10 }
  0x1b   :  { %302 = vmatpush.bf16.msra.mxu2 %v421_v50 }
  0x1c   :  { %182 = vmatpush.bf16.msra.mxu1 %v412_v12 }
  0x1f   :  { %303 = vmatpush.bf16.msra.mxu2 %v420_v52 }
  0x20   :  { %183 = vmatpush.bf16.msra.mxu1 %v411_v15 }
  0x23   :  { %304 = vmatpush.bf16.msra.mxu2 %v419_v55 }
  0x86   :  { %v64_v13 = vpop.f32.mrf.mxu0 }
  0x87   :  { %v65_v14 = vadd.f32 %v430_v11, %v64_v13 }
  0x89   :  { %v341_v16 = vmul.f32 -1.442695, %v65_v14 }
  0x8b   :  { %433 = vpow2.f32 %v341_v16 }
  0x8e   :  { %v66_v17 = vpop.f32.mrf.mxu0 }
  0x8f   :  { %v67_v18 = vadd.f32 %v430_v11, %v66_v17 }
  0x91   :  { %v434_v19 = vpop.eup %433  ;;  %v342_v20 = vmul.f32 -1.442695, %v67_v18 }
  0x92   :  { %v75_v21 = vadd.f32 1.0, %v434_v19 }
  0x93   :  { %435 = vpow2.f32 %v342_v20 }
  0x94   :  { %437 = vrcp.f32 %v75_v21  ;;  %vm82_vm2 = vweird.f32 %v75_v21  ;;  %v88_v32 = vand.u32 2147483648, %v75_v21  ;;  %v86_v34 = vand.u32 2147483647, %v75_v21 }
  0x96   :  { %v89_v39 = vor.u32 1.1754944e-38, %v88_v32  ;;  %vm87_vm7 = vcmp.eq.f32.partialorder %v86_v34, 8.507059e+37 }
  0x99   :  { %v436_v22 = vpop.eup %435 }
  0x9a   :  { %v438_v23 = vpop.eup %437  ;;  %v76_v24 = vadd.f32 1.0, %v436_v22 }
  0x9b   :  { %v78_v25 = vmul.f32 %v438_v23, %v75_v21  ;;  %vm83_vm1 = vweird.f32 %v438_v23  ;;  %v432_v21 = vld [vmem:[%s596_s6] ss:$0 sm:$0xff] }
  0x9c   :  { %439 = vrcp.f32 %v76_v24  ;;  %v103_v33 = vand.u32 2147483648, %v76_v24  ;;  %v101_v36 = vand.u32 2147483647, %v76_v24  ;;  %vm84_vm4 = vmor %vm82_vm2, %vm83_vm1  ;;  %vm97_vm5 = vweird.f32 %v76_v24 }
  0x9d   :  { %v79_v26 = vsub.f32 1.0, %v78_v25  ;;  %vm311_vm1 = vcmask 80896  }
  0x9e   :  { %v104_v40 = vor.u32 1.1754944e-38, %v103_v33  ;;  %vm102_vm8 = vcmp.eq.f32.partialorder %v101_v36, 8.507059e+37 }
  0x9f   :  { %v80_v27 = vmul.f32 %v438_v23, %v79_v26 }
  0xa1   :  { %v81_v30 = vadd.f32 %v438_v23, %v80_v27 }
  0xa2   :  { %v440_v28 = vpop.eup %439 }
  0xa3   :  { %v93_v29 = vmul.f32 %v440_v28, %v76_v24  ;;  %vm98_vm3 = vweird.f32 %v440_v28  ;;  %v85_v37 = vsel %vm84_vm4, %v438_v23, %v81_v30 }
  0xa4   :  { %vm99_vm6 = vmor %vm97_vm5, %vm98_vm3  ;;  %v90_v42 = vsel %vm87_vm7, %v89_v39, %v85_v37 }
  0xa5   :  { %v94_v31 = vsub.f32 1.0, %v93_v29 }
  0xa7   :  { %v95_v35 = vmul.f32 %v440_v28, %v94_v31 }
  0xa9   :  { %v96_v38 = vadd.f32 %v440_v28, %v95_v35 }
  0xab   :  { %v100_v41 = vsel %vm99_vm6, %v440_v28, %v96_v38 }
  0xac   :  { %v105_v43 = vsel %vm102_vm8, %v104_v40, %v100_v41 }
  0xad   :  { %v107_v44 = vpack.c.bf16 %v105_v43, %v90_v42 }
  0xaf   :  { %184 = vmatmul.bf16.vlgmr.msra.gmra.mxu1 %v107_v44 }
 0x12c   :  { %v185_v53 = vpop.f32.mrf.mxu1 }
 0x12d   :  { %v186_v54 = vadd.f32 %v431_v51, %v185_v53 }
 0x12f   :  { %v375_v56 = vmul.f32 -1.442695, %v186_v54 }
 0x131   :  { %441 = vpow2.f32 %v375_v56 }
 0x134   :  { %v187_v57 = vpop.f32.mrf.mxu1 }
 0x135   :  { %v188_v58 = vadd.f32 %v431_v51, %v187_v57 }
 0x137   :  { %v442_v59 = vpop.eup %441  ;;  %v376_v60 = vmul.f32 -1.442695, %v188_v58 }
 0x138   :  { %v196_v61 = vadd.f32 1.0, %v442_v59 }
 0x139   :  { %443 = vpow2.f32 %v376_v60 }
 0x13a   :  { %445 = vrcp.f32 %v196_v61  ;;  %vm203_vm10 = vweird.f32 %v196_v61  ;;  %v209_v8 = vand.u32 2147483648, %v196_v61  ;;  %v207_v10 = vand.u32 2147483647, %v196_v61 }
 0x13c   :  { %v210_v15 = vor.u32 1.1754944e-38, %v209_v8  ;;  %vm208_vm15 = vcmp.eq.f32.partialorder %v207_v10, 8.507059e+37 }
 0x13f   :  { %v444_v62 = vpop.eup %443 }
 0x140   :  { %v446_v63 = vpop.eup %445  ;;  %v197_v0 = vadd.f32 1.0, %v444_v62 }
 0x141   :  { %v199_v1 = vmul.f32 %v446_v63, %v196_v61  ;;  %vm204_vm9 = vweird.f32 %v446_v63 }
 0x142   :  { %447 = vrcp.f32 %v197_v0  ;;  %v224_v9 = vand.u32 2147483648, %v197_v0  ;;  %v222_v12 = vand.u32 2147483647, %v197_v0  ;;  %vm205_vm12 = vmor %vm203_vm10, %vm204_vm9  ;;  %vm218_vm13 = vweird.f32 %v197_v0 }
 0x143   :  { %v200_v2 = vsub.f32 1.0, %v199_v1 }
 0x144   :  { %v225_v16 = vor.u32 1.1754944e-38, %v224_v9  ;;  %vm223_vm0 = vcmp.eq.f32.partialorder %v222_v12, 8.507059e+37 }
 0x145   :  { %v201_v3 = vmul.f32 %v446_v63, %v200_v2 }
 0x147   :  { %v202_v6 = vadd.f32 %v446_v63, %v201_v3 }
 0x148   :  { %v448_v4 = vpop.eup %447 }
 0x149   :  { %v214_v5 = vmul.f32 %v448_v4, %v197_v0  ;;  %vm219_vm11 = vweird.f32 %v448_v4  ;;  %v206_v13 = vsel %vm205_vm12, %v446_v63, %v202_v6 }
 0x14a   :  { %vm220_vm14 = vmor %vm218_vm13, %vm219_vm11  ;;  %v211_v18 = vsel %vm208_vm15, %v210_v15, %v206_v13 }
 0x14b   :  { %v215_v7 = vsub.f32 1.0, %v214_v5 }
 0x14d   :  { %v216_v11 = vmul.f32 %v448_v4, %v215_v7 }
 0x14f   :  { %v217_v14 = vadd.f32 %v448_v4, %v216_v11 }
 0x151   :  { %v221_v17 = vsel %vm220_vm14, %v448_v4, %v217_v14 }
 0x152   :  { %v226_v19 = vsel %vm223_vm0, %v225_v16, %v221_v17 }
 0x153   :  { %v228_v20 = vpack.c.bf16 %v226_v19, %v211_v18 }
 0x155   :  { %305 = vmatmul.bf16.vlgmr.msra.gmra.mxu2 %v228_v20 }
 0x1d8   :  { %v306_v22 = vpop.f32.mrf.mxu2 }
 0x1d9   :  { %v307_v23 = vadd.f32 %v432_v21, %v306_v22 }
 0x1db   :  { %312 = vst.msk [vmem:[#allocation2] sm:$0xff] %vm311_vm1, %v307_v23 }
 0x1e0   :  { %v308_v24 = vpop.f32.mrf.mxu2 }
 0x1e1   :  { %v309_v25 = vadd.f32 %v432_v21, %v308_v24 }
 0x1e3   :  { %313 = vst.msk [vmem:[#allocation2 + $0x8] sm:$0xff] %vm311_vm1, %v309_v25 }
 0x1e4   :  { %326 = dma.vmem_to_hbm [thread:$0]  %s319_s17, 256, %s321_s20, [#allocation3], %s476_s21, %s476_s21, %s477_s22  }
 0x1e5   :  { %473 = dma.done.wait [#allocation3], 256  }
 0x1e6   :  { %474 = vsyncadd [#allocation3], 4294967040 }
 0x1e7   :  { %331 = vsyncpa [#allocation3], 1 }

</bundles_post_ra>
